<compile_context>
chip_gen: v5e
topology: v5e:2x2
jax: 0.10.0
libtpu: 0.0.40
codegen_flags: <defaults>
</compile_context>

<pallas_src>
import jax
import jax.numpy as jnp
from jax.experimental import pallas as pl
from jax.experimental.pallas import tpu as pltpu


def _round_up(n, m):
    return ((n + m - 1) // m) * m


def make_dnn_kernel(num_layers):
    """Kernel fusing `num_layers` Linear layers (Dropout == identity at eval)."""

    def kernel(*refs):
        # refs = (x_ref, w0, b0, w1, b1, ..., o_ref)
        x_ref = refs[0]
        o_ref = refs[-1]
        h = x_ref[...].astype(jnp.float32)          # activations stay f32 (VPU)
        for l in range(num_layers):
            w = refs[1 + 2 * l][...]                # bf16 (pre-cast in wrapper)
            b = refs[2 + 2 * l][...]                # f32 (1, out) -> broadcasts
            # bf16 MXU inputs, f32 accumulation, f32 bias add.
            h = jnp.dot(h.astype(jnp.bfloat16), w,
                        preferred_element_type=jnp.float32) + b
        o_ref[...] = h.astype(o_ref.dtype)

    return kernel


def dnn_forward(x, params, *, batch_tile_cap=512):
    """params: list of (W (in,out) f32, b (1,out) f32) for fl + each layer in nets.

    Pads all feature dims to multiples of 128 (lane-dense), pads batch to the
    tile size, casts weights to bf16, runs one fused pallas_call, slices back.
    """
    B, in_dim = x.shape
    num_layers = len(params)
    out_dim = params[-1][0].shape[1]

    # --- pad feature dims to multiples of 128 and pre-cast weights to bf16 ---
    in_pad = _round_up(in_dim, 128)
    flat_params = []
    for w, b in params:
        di, do = w.shape
        dip, dop = _round_up(di, 128), _round_up(do, 128)
        wp = jnp.zeros((dip, dop), jnp.float32).at[:di, :do].set(w)
        wp = wp.astype(jnp.bfloat16)                         # MXU-native input
        bp = jnp.zeros((1, dop), jnp.float32).at[:, :do].set(b)  # bias stays f32
        flat_params.extend([wp, bp])
    out_pad = flat_params[-1].shape[1]

    # --- pick a fat batch tile; pad batch so the grid divides evenly ---------
    # (On v7x, keep batch_tile <= B/2 for realistic batches so the "parallel"
    #  grid axis has >=2 programs and both TensorCores are used.)
    B8 = _round_up(B, 8)
    batch_tile = min(batch_tile_cap, B8)
    B_pad = _round_up(B8, batch_tile)
    x_pad = jnp.zeros((B_pad, in_pad), x.dtype).at[:B, :in_dim].set(x)

    grid = (B_pad // batch_tile,)

    in_specs = [pl.BlockSpec((batch_tile, in_pad), lambda i: (i, 0))]
    for p in flat_params:
        # Full-array, grid-invariant blocks: single-buffer them (no point
        # double-buffering something whose index_map never changes).
        in_specs.append(
            pl.BlockSpec(p.shape, lambda i: (0, 0),
                         pipeline_mode=pl.Buffered(1)))
    out_specs = pl.BlockSpec((batch_tile, out_pad), lambda i: (i, 0))

    # Explicit VMEM budget: single-buffered params + double-buffered act tiles.
    param_bytes = sum(int(p.size) * p.dtype.itemsize for p in flat_params)
    act_bytes = 2 * 2 * batch_tile * (in_pad + out_pad) * 4
    vmem_limit = min(int(1.5 * (param_bytes + act_bytes)) + (4 << 20), 100 << 20)

    out = pl.pallas_call(
        make_dnn_kernel(num_layers),
        out_shape=jax.ShapeDtypeStruct((B_pad, out_pad), x.dtype),
        grid_spec=pltpu.PrefetchScalarGridSpec(
            num_scalar_prefetch=0,
            grid=grid,
            in_specs=in_specs,
            out_specs=out_specs,
        ),
        compiler_params=pltpu.CompilerParams(
            dimension_semantics=("parallel",),
            vmem_limit_bytes=vmem_limit),
    )(x_pad, *flat_params)

    return out[:B, :out_dim]


def init_linear(key, in_features, out_features):
    """PyTorch nn.Linear default init: U(-1/sqrt(in), 1/sqrt(in)) for W and b."""
    kw, kb = jax.random.split(key)
    bound = 1.0 / (in_features ** 0.5)
    # Stored already transposed to (in, out) for the kernel's x @ W convention.
    w = jax.random.uniform(kw, (in_features, out_features), jnp.float32,
                           minval=-bound, maxval=bound)
    b = jax.random.uniform(kb, (1, out_features), jnp.float32,
                           minval=-bound, maxval=bound)
    return w, b


def build_dnn_params(key, setting, input_nums):
    """Mirror DNN.__init__: fl = Linear(input_nums, setting[0][0]);
    nets = [Linear(setting[i][0], setting[i+1][0]) + Dropout(setting[i][1]) ...]."""
    dims = [input_nums] + [s[0] for s in setting]
    params = []
    for i in range(len(dims) - 1):
        key, sub = jax.random.split(key)
        params.append(init_linear(sub, dims[i], dims[i + 1]))
    return params


def dnn_reference(x, params):
    """Same mixed precision as the kernel: bf16 MXU inputs, f32 accum + bias."""
    h = x.astype(jnp.float32)
    for w, b in params:
        h = jnp.dot(h.astype(jnp.bfloat16), w.astype(jnp.bfloat16),
                    preferred_element_type=jnp.float32) + b
    return h


if __name__ == "__main__":
    # Small shapes consistent with the module's forward.
    setting = [(32, 0.1), (64, 0.2), (16, 0.0)]   # (features, dropout_rate)
    input_nums = 16
    batch = 64

    key = jax.random.PRNGKey(0)
    kx, kp = jax.random.split(key)
    x = jax.random.normal(kx, (batch, input_nums), jnp.float32)
    params = build_dnn_params(kp, setting, input_nums)

    out = dnn_forward(x, params)
    out = jax.block_until_ready(out)

    ref = dnn_reference(x, params)
    assert out.shape == (batch, setting[-1][0]), out.shape
    assert jnp.allclose(out, ref, atol=2e-3, rtol=2e-3), "mismatch vs JAX reference"

    print("KERNEL_OK")
</pallas_src>

<mosaic_0001>
module attributes {stable_mosaic.version = 11 : i64} {
  func.func @kernel(%arg0: i32, %arg1: memref<64x128xf32, #tpu.memory_space<vmem>>, %arg2: memref<128x128xbf16, #tpu.memory_space<vmem>>, %arg3: memref<1x128xf32, #tpu.memory_space<vmem>>, %arg4: memref<128x128xbf16, #tpu.memory_space<vmem>>, %arg5: memref<1x128xf32, #tpu.memory_space<vmem>>, %arg6: memref<128x128xbf16, #tpu.memory_space<vmem>>, %arg7: memref<1x128xf32, #tpu.memory_space<vmem>>, %arg8: memref<64x128xf32, #tpu.memory_space<vmem>>) attributes {dimension_semantics = [#tpu.dimension_semantics<parallel>], iteration_bounds = array<i64: 1>, scalar_prefetch = 0 : i64, scratch_operands = 0 : i64, tpu.core_type = #tpu.core_type<tc>, window_params = [{transform_indices = @transform_0, window_bounds = array<i64: 64, 128>}, {pipeline_mode = #tpu.pipeline_mode<synchronous>, transform_indices = @transform_1, window_bounds = array<i64: 128, 128>}, {pipeline_mode = #tpu.pipeline_mode<synchronous>, transform_indices = @transform_2, window_bounds = array<i64: 1, 128>}, {pipeline_mode = #tpu.pipeline_mode<synchronous>, transform_indices = @transform_3, window_bounds = array<i64: 128, 128>}, {pipeline_mode = #tpu.pipeline_mode<synchronous>, transform_indices = @transform_4, window_bounds = array<i64: 1, 128>}, {pipeline_mode = #tpu.pipeline_mode<synchronous>, transform_indices = @transform_5, window_bounds = array<i64: 128, 128>}, {pipeline_mode = #tpu.pipeline_mode<synchronous>, transform_indices = @transform_6, window_bounds = array<i64: 1, 128>}, {transform_indices = @transform_7, window_bounds = array<i64: 64, 128>}]} {
    %c0 = arith.constant 0 : index
    %c0_0 = arith.constant 0 : index
    %0 = vector.load %arg1[%c0, %c0_0] : memref<64x128xf32, #tpu.memory_space<vmem>>, vector<64x128xf32>
    %c0_1 = arith.constant 0 : index
    %c0_2 = arith.constant 0 : index
    %1 = vector.load %arg2[%c0_1, %c0_2] : memref<128x128xbf16, #tpu.memory_space<vmem>>, vector<128x128xbf16>
    %c0_3 = arith.constant 0 : index
    %c0_4 = arith.constant 0 : index
    %2 = vector.load %arg3[%c0_3, %c0_4] : memref<1x128xf32, #tpu.memory_space<vmem>>, vector<1x128xf32>
    %3 = arith.truncf %0 : vector<64x128xf32> to vector<64x128xbf16>
    %cst = arith.constant dense<0.000000e+00> : vector<64x128xf32>
    %4 = tpu.matmul %3, %1, %cst {dimension_numbers = #tpu.dot_dimension_numbers<[1], [0], [0], [1], [0, 0, 1, 1], [], []>} : vector<64x128xbf16>, vector<128x128xbf16>, vector<64x128xf32> -> vector<64x128xf32>
    %5 = vector.broadcast %2 : vector<1x128xf32> to vector<64x128xf32>
    %6 = arith.addf %4, %5 : vector<64x128xf32>
    %c0_5 = arith.constant 0 : index
    %c0_6 = arith.constant 0 : index
    %7 = vector.load %arg4[%c0_5, %c0_6] : memref<128x128xbf16, #tpu.memory_space<vmem>>, vector<128x128xbf16>
    %c0_7 = arith.constant 0 : index
    %c0_8 = arith.constant 0 : index
    %8 = vector.load %arg5[%c0_7, %c0_8] : memref<1x128xf32, #tpu.memory_space<vmem>>, vector<1x128xf32>
    %9 = arith.truncf %6 : vector<64x128xf32> to vector<64x128xbf16>
    %cst_9 = arith.constant dense<0.000000e+00> : vector<64x128xf32>
    %10 = tpu.matmul %9, %7, %cst_9 {dimension_numbers = #tpu.dot_dimension_numbers<[1], [0], [0], [1], [0, 0, 1, 1], [], []>} : vector<64x128xbf16>, vector<128x128xbf16>, vector<64x128xf32> -> vector<64x128xf32>
    %11 = vector.broadcast %8 : vector<1x128xf32> to vector<64x128xf32>
    %12 = arith.addf %10, %11 : vector<64x128xf32>
    %c0_10 = arith.constant 0 : index
    %c0_11 = arith.constant 0 : index
    %13 = vector.load %arg6[%c0_10, %c0_11] : memref<128x128xbf16, #tpu.memory_space<vmem>>, vector<128x128xbf16>
    %c0_12 = arith.constant 0 : index
    %c0_13 = arith.constant 0 : index
    %14 = vector.load %arg7[%c0_12, %c0_13] : memref<1x128xf32, #tpu.memory_space<vmem>>, vector<1x128xf32>
    %15 = arith.truncf %12 : vector<64x128xf32> to vector<64x128xbf16>
    %cst_14 = arith.constant dense<0.000000e+00> : vector<64x128xf32>
    %16 = tpu.matmul %15, %13, %cst_14 {dimension_numbers = #tpu.dot_dimension_numbers<[1], [0], [0], [1], [0, 0, 1, 1], [], []>} : vector<64x128xbf16>, vector<128x128xbf16>, vector<64x128xf32> -> vector<64x128xf32>
    %17 = vector.broadcast %14 : vector<1x128xf32> to vector<64x128xf32>
    %18 = arith.addf %16, %17 : vector<64x128xf32>
    %c0_15 = arith.constant 0 : index
    %c0_16 = arith.constant 0 : index
    %19 = vector.load %arg8[%c0_15, %c0_16] : memref<64x128xf32, #tpu.memory_space<vmem>>, vector<64x128xf32>
    tpu.vector_store %arg8[%c0_15, %c0_16], %18 {strides = array<i32>} : memref<64x128xf32, #tpu.memory_space<vmem>>, vector<64x128xf32>,
    return
  }
  func.func @transform_0(%arg0: i32) -> (i32, i32) {
    %c0_i32 = arith.constant 0 : i32
    %c0_i32_0 = arith.constant 0 : i32
    return %arg0, %c0_i32 : i32, i32
  }
  func.func @transform_1(%arg0: i32) -> (i32, i32) {
    %c0_i32 = arith.constant 0 : i32
    %c0_i32_0 = arith.constant 0 : i32
    %c0_i32_1 = arith.constant 0 : i32
    return %c0_i32, %c0_i32_0 : i32, i32
  }
  func.func @transform_2(%arg0: i32) -> (i32, i32) {
    %c0_i32 = arith.constant 0 : i32
    %c0_i32_0 = arith.constant 0 : i32
    %c0_i32_1 = arith.constant 0 : i32
    return %c0_i32, %c0_i32_0 : i32, i32
  }
  func.func @transform_3(%arg0: i32) -> (i32, i32) {
    %c0_i32 = arith.constant 0 : i32
    %c0_i32_0 = arith.constant 0 : i32
    %c0_i32_1 = arith.constant 0 : i32
    return %c0_i32, %c0_i32_0 : i32, i32
  }
  func.func @transform_4(%arg0: i32) -> (i32, i32) {
    %c0_i32 = arith.constant 0 : i32
    %c0_i32_0 = arith.constant 0 : i32
    %c0_i32_1 = arith.constant 0 : i32
    return %c0_i32, %c0_i32_0 : i32, i32
  }
  func.func @transform_5(%arg0: i32) -> (i32, i32) {
    %c0_i32 = arith.constant 0 : i32
    %c0_i32_0 = arith.constant 0 : i32
    %c0_i32_1 = arith.constant 0 : i32
    return %c0_i32, %c0_i32_0 : i32, i32
  }
  func.func @transform_6(%arg0: i32) -> (i32, i32) {
    %c0_i32 = arith.constant 0 : i32
    %c0_i32_0 = arith.constant 0 : i32
    %c0_i32_1 = arith.constant 0 : i32
    return %c0_i32, %c0_i32_0 : i32, i32
  }
  func.func @transform_7(%arg0: i32) -> (i32, i32) {
    %c0_i32 = arith.constant 0 : i32
    %c0_i32_0 = arith.constant 0 : i32
    return %arg0, %c0_i32 : i32, i32
  }
}

</mosaic_0001>

<bundles_post_ra>
// kernel: tpu_custom_call.1
= control target key start
LH: loop header
LB: loop body
LE: loop exit
PB: predicated region body
PF: predicated region fallthrough
CT: control target
= control target key end

     0   :  { %12 = vsyncpa [#allocation3], 0  ;;  %s777_s0 = inlined_call_operand.hbm [shape: f32[64,128], index: 0, kind: input, shape index: {}]   ;;  %s778_s1 = inlined_call_operand.hbm [shape: bf16[128,128], index: 1, kind: input, shape index: {}]   ;;  %s779_s2 = inlined_call_operand.vmem [shape: f32[1,128], index: 2, kind: input, shape index: {}]   ;;  %s780_s3 = inlined_call_operand.hbm [shape: bf16[128,128], index: 3, kind: input, shape index: {}]   ;;  %s781_s4 = inlined_call_operand.vmem [shape: f32[1,128], index: 4, kind: input, shape index: {}]   ;;  %s782_s5 = inlined_call_operand.hbm [shape: bf16[128,128], index: 5, kind: input, shape index: {}]   ;;  %s783_s6 = inlined_call_operand.vmem [shape: f32[1,128], index: 6, kind: input, shape index: {}]   ;;  %s784_s7 = inlined_call_operand.hbm [shape: f32[64,128], index: 7, kind: output, shape index: {}]  }
   0x1   :  { %13 = vsyncpa [#allocation6], 0 }
   0x2   :  { %14 = vsyncpa [#allocation9], 0  ;;  %s33_s26 = sshll.u32 %s778_s1, 4  ;;  %s34_s26 = int_to_ptr.hbm [resolvable:$true] %s33_s26 }
   0x3   :  { %15 = vsyncpa [#allocation4], 0  ;;  %s698_s27 = smov [#allocation5]   ;;  %s20_s8 = sshll.u32 %s777_s0, 4  ;;  %s21_s8 = int_to_ptr.hbm [resolvable:$true] %s20_s8 }
   0x4   :  { %s35_s28 = sshll.u32 %s698_s27, 4  ;;  %s699_s9 = smov 64   ;;  %s36_s28 = int_to_ptr.vmem [resolvable:$true] %s35_s28 }
   0x5   :  { %s700_s10 = smov 4   ;;  %s701_s11 = smov [#allocation2]  }
   0x6   :  { %41 = dma.hbm_to_vmem [thread:$0]  %s34_s26, 1024, %s36_s28, [#allocation6], %s699_s9, %s699_s9, %s700_s10  }
   0x7   :  { %s22_s12 = sshll.u32 %s701_s11, 4  ;;  %s702_s13 = smov 128   ;;  %s23_s12 = int_to_ptr.vmem [resolvable:$true] %s22_s12 }
   0x8   :  { %s703_s14 = smov 8   ;;  %s48_s16 = sshll.u32 %s780_s3, 4  ;;  %s49_s16 = int_to_ptr.hbm [resolvable:$true] %s48_s16 }
   0x9   :  { %28 = dma.hbm_to_vmem [thread:$0]  %s21_s8, 1024, %s23_s12, [#allocation3], %s702_s13, %s702_s13, %s703_s14  }
   0xa   :  { %s704_s17 = smov [#allocation7]   ;;  %s63_s20 = sshll.u32 %s782_s5, 4  ;;  %s64_s20 = int_to_ptr.hbm [resolvable:$true] %s63_s20 }
   0xb   :  { %s50_s0 = sshll.u32 %s704_s17, 4  ;;  %s705_s21 = smov [#allocation8]   ;;  %s51_s0 = int_to_ptr.vmem [resolvable:$true] %s50_s0 }
   0xc   :  { %56 = dma.hbm_to_vmem [thread:$0]  %s49_s16, 1024, %s51_s0, [#allocation6], %s699_s9, %s699_s9, %s700_s10  }
   0xd   :  { %s65_s22 = sshll.u32 %s705_s21, 4  ;;  %s66_s22 = int_to_ptr.vmem [resolvable:$true] %s65_s22 }
   0xe   :  { %71 = dma.hbm_to_vmem [thread:$0]  %s64_s20, 1024, %s66_s22, [#allocation9], %s699_s9, %s699_s9, %s700_s10  }
   0xf   :  { %690 = dma.done.wait [#allocation3], 1024  }
  0x10   :  { %691 = vsyncadd [#allocation3], 4294966272 }
  0x11   :  { %692 = dma.done.wait [#allocation6], 2048  }
  0x12   :  { %693 = vsyncadd [#allocation6], 4294965248 }
  0x13   :  { %694 = dma.done.wait [#allocation9], 1024  }
  0x14   :  { %695 = vsyncadd [#allocation9], 4294966272  ;;  %v533_v0 = vld [vmem:[#allocation5 + $0x38] sm:$0xff]  ;;  %v532_v1 = vld [vmem:[#allocation5 + $0x30] sm:$0xff]  ;;  %s415_s28 = sshll.u32 %s784_s7, 4  ;;  %s416_s28 = int_to_ptr.hbm [resolvable:$true] %s415_s28 }
  0x15   :  { %170 = vmatpush.bf16.msra.mxu0 %v533_v0  ;;  %550 = vmatpush.bf16.msra.mxu3 %v533_v0  ;;  %v531_v2 = vld [vmem:[#allocation5 + $0x28] sm:$0xff]  ;;  %v530_v3 = vld [vmem:[#allocation5 + $0x20] sm:$0xff]  ;;  %v529_v4 = vld [vmem:[#allocation5 + $0x18] sm:$0xff] }
  0x16   :  { %v528_v5 = vld [vmem:[#allocation5 + $0x10] sm:$0xff]  ;;  %v527_v6 = vld [vmem:[#allocation5 + $0x8] sm:$0xff]  ;;  %v526_v7 = vld [vmem:[#allocation5] sm:$0xff] }
  0x17   :  { %v90_v8 = vld [vmem:[#allocation2] sm:$0xff]  ;;  %v91_v9 = vld [vmem:[#allocation2 + $0x8] sm:$0xff]  ;;  %v92_v10 = vld [vmem:[#allocation2 + $0x10] sm:$0xff] }
  0x18   :  { %v93_v11 = vld [vmem:[#allocation2 + $0x18] sm:$0xff]  ;;  %v115_v12 = vpack.c.bf16 %v91_v9, %v90_v8  ;;  %v540_v15 = vld [vmem:[#allocation7 + $0x30] sm:$0xff]  ;;  %v539_v16 = vld [vmem:[#allocation7 + $0x28] sm:$0xff] }
  0x19   :  { %171 = vmatpush.bf16.msra.mxu0 %v532_v1  ;;  %551 = vmatpush.bf16.msra.mxu3 %v532_v1  ;;  %v116_v13 = vpack.c.bf16 %v93_v11, %v92_v10  ;;  %v541_v14 = vld [vmem:[#allocation7 + $0x38] sm:$0xff]  ;;  %v94_v17 = vld [vmem:[#allocation2 + $0x20] sm:$0xff]  ;;  %v95_v18 = vld [vmem:[#allocation2 + $0x28] sm:$0xff] }
  0x1a   :  { %271 = vmatpush.bf16.msra.mxu1 %v541_v14  ;;  %v538_v19 = vld [vmem:[#allocation7 + $0x20] sm:$0xff]  ;;  %v117_v20 = vpack.c.bf16 %v95_v18, %v94_v17  ;;  %v537_v21 = vld [vmem:[#allocation7 + $0x18] sm:$0xff]  ;;  %v96_v22 = vld [vmem:[#allocation2 + $0x30] sm:$0xff] }
  0x1b   :  { %v97_v23 = vld [vmem:[#allocation2 + $0x38] sm:$0xff]  ;;  %v536_v25 = vld [vmem:[#allocation7 + $0x10] sm:$0xff]  ;;  %v535_v26 = vld [vmem:[#allocation7 + $0x8] sm:$0xff] }
  0x1c   :  { %v118_v24 = vpack.c.bf16 %v97_v23, %v96_v22  ;;  %v534_v27 = vld [vmem:[#allocation7] sm:$0xff]  ;;  %v549_v40 = vld [vmem:[#allocation8 + $0x38] sm:$0xff]  ;;  %v548_v41 = vld [vmem:[#allocation8 + $0x30] sm:$0xff] }
  0x1d   :  { %172 = vmatpush.bf16.msra.mxu0 %v531_v2  ;;  %552 = vmatpush.bf16.msra.mxu3 %v531_v2  ;;  %v567_v29 = vld [vmem:[%s779_s2] ss:$0 sm:$0xff]  ;;  %v547_v43 = vld [vmem:[#allocation8 + $0x28] sm:$0xff]  ;;  %v545_v49 = vld [vmem:[#allocation8 + $0x18] sm:$0xff] }
  0x1e   :  { %272 = vmatpush.bf16.msra.mxu1 %v540_v15  ;;  %372 = vmatpush.bf16.msra.mxu2 %v549_v40  ;;  %v546_v46 = vld [vmem:[#allocation8 + $0x20] sm:$0xff]  ;;  %v544_v54 = vld [vmem:[#allocation8 + $0x10] sm:$0xff]  ;;  %v543_v55 = vld [vmem:[#allocation8 + $0x8] sm:$0xff] }
  0x1f   :  { %v542_v56 = vld [vmem:[#allocation8] sm:$0xff] }
  0x20   :  { %v568_v58 = vld [vmem:[%s781_s4] ss:$0 sm:$0xff] }
  0x21   :  { %173 = vmatpush.bf16.msra.mxu0 %v530_v3  ;;  %553 = vmatpush.bf16.msra.mxu3 %v530_v3  ;;  %v569_v14 = vld [vmem:[%s783_s6] ss:$0 sm:$0xff]  ;;  %s706_s6 = smov [#allocation10]  }
  0x22   :  { %273 = vmatpush.bf16.msra.mxu1 %v539_v16  ;;  %373 = vmatpush.bf16.msra.mxu2 %v548_v41  ;;  %s413_s25 = sshll.u32 %s706_s6, 4  ;;  %s414_s25 = int_to_ptr.vmem [resolvable:$true] %s413_s25 }
  0x25   :  { %174 = vmatpush.bf16.msra.mxu0 %v529_v4  ;;  %554 = vmatpush.bf16.msra.mxu3 %v529_v4 }
  0x26   :  { %274 = vmatpush.bf16.msra.mxu1 %v538_v19  ;;  %374 = vmatpush.bf16.msra.mxu2 %v547_v43 }
  0x29   :  { %175 = vmatpush.bf16.msra.mxu0 %v528_v5  ;;  %555 = vmatpush.bf16.msra.mxu3 %v528_v5 }
  0x2a   :  { %275 = vmatpush.bf16.msra.mxu1 %v537_v21  ;;  %375 = vmatpush.bf16.msra.mxu2 %v546_v46 }
  0x2d   :  { %176 = vmatpush.bf16.msra.mxu0 %v527_v6  ;;  %556 = vmatpush.bf16.msra.mxu3 %v527_v6 }
  0x2e   :  { %276 = vmatpush.bf16.msra.mxu1 %v536_v25  ;;  %376 = vmatpush.bf16.msra.mxu2 %v545_v49 }
  0x31   :  { %177 = vmatpush.bf16.msra.mxu0 %v526_v7  ;;  %557 = vmatpush.bf16.msra.mxu3 %v526_v7 }
  0x32   :  { %277 = vmatpush.bf16.msra.mxu1 %v535_v26  ;;  %377 = vmatpush.bf16.msra.mxu2 %v544_v54 }
  0x34   :  { %178 = vmatmul.bf16.vlgmr.msra.gmra.mxu0 %v115_v12  ;;  %183 = vmatmul.bf16.vlgmr.msra.gmra.mxu3 %v116_v13 }
  0x36   :  { %278 = vmatpush.bf16.msra.mxu1 %v534_v27  ;;  %378 = vmatpush.bf16.msra.mxu2 %v543_v55 }
  0x3a   :  { %379 = vmatpush.bf16.msra.mxu2 %v542_v56 }
  0x44   :  { %188 = vmatmul.bf16.gmra.mxu3 %v117_v20 }
  0x54   :  { %193 = vmatmul.bf16.gmra.mxu3 %v118_v24 }
  0xb1   :  { %v179_v28 = vpop.f32.mrf.mxu0 }
  0xb2   :  { %v180_v32 = vadd.f32 %v567_v29, %v179_v28 }
  0xb7   :  { %v184_v30 = vpop.f32.mrf.mxu3 }
  0xb8   :  { %v185_v37 = vadd.f32 %v567_v29, %v184_v30 }
  0xb9   :  { %v181_v31 = vpop.f32.mrf.mxu0 }
  0xba   :  { %v182_v33 = vadd.f32 %v567_v29, %v181_v31 }
  0xbc   :  { %v216_v34 = vpack.c.bf16 %v182_v33, %v180_v32 }
  0xbe   :  { %279 = vmatmul.bf16.vlgmr.msra.gmra.mxu1 %v216_v34 }
  0xbf   :  { %v186_v35 = vpop.f32.mrf.mxu3 }
  0xc0   :  { %v187_v38 = vadd.f32 %v567_v29, %v186_v35 }
  0xc2   :  { %v217_v39 = vpack.c.bf16 %v187_v38, %v185_v37 }
  0xc7   :  { %v189_v36 = vpop.f32.mrf.mxu3 }
  0xc8   :  { %v190_v44 = vadd.f32 %v567_v29, %v189_v36 }
  0xce   :  { %284 = vmatmul.bf16.gmra.mxu1 %v217_v39 }
  0xcf   :  { %v191_v42 = vpop.f32.mrf.mxu3 }
  0xd0   :  { %v192_v45 = vadd.f32 %v567_v29, %v191_v42 }
  0xd2   :  { %v218_v48 = vpack.c.bf16 %v192_v45, %v190_v44 }
  0xd7   :  { %v194_v47 = vpop.f32.mrf.mxu3 }
  0xd8   :  { %v195_v51 = vadd.f32 %v567_v29, %v194_v47 }
  0xde   :  { %289 = vmatmul.bf16.gmra.mxu1 %v218_v48 }
  0xdf   :  { %v196_v50 = vpop.f32.mrf.mxu3 }
  0xe0   :  { %v197_v52 = vadd.f32 %v567_v29, %v196_v50 }
  0xe2   :  { %v219_v53 = vpack.c.bf16 %v197_v52, %v195_v51 }
  0xee   :  { %294 = vmatmul.bf16.gmra.mxu1 %v219_v53 }
 0x13b   :  { %v280_v57 = vpop.f32.mrf.mxu1 }
 0x13c   :  { %v281_v60 = vadd.f32 %v568_v58, %v280_v57 }
 0x143   :  { %v282_v59 = vpop.f32.mrf.mxu1 }
 0x144   :  { %v283_v61 = vadd.f32 %v568_v58, %v282_v59 }
 0x146   :  { %v317_v62 = vpack.c.bf16 %v283_v61, %v281_v60 }
 0x148   :  { %380 = vmatmul.bf16.vlgmr.msra.gmra.mxu2 %v317_v62 }
 0x14b   :  { %v285_v63 = vpop.f32.mrf.mxu1 }
 0x14c   :  { %v286_v1 = vadd.f32 %v568_v58, %v285_v63 }
 0x153   :  { %v287_v0 = vpop.f32.mrf.mxu1 }
 0x154   :  { %v288_v2 = vadd.f32 %v568_v58, %v287_v0 }
 0x156   :  { %v318_v3 = vpack.c.bf16 %v288_v2, %v286_v1 }
 0x158   :  { %385 = vmatmul.bf16.gmra.mxu2 %v318_v3 }
 0x15b   :  { %v290_v4 = vpop.f32.mrf.mxu1 }
 0x15c   :  { %v291_v6 = vadd.f32 %v568_v58, %v290_v4 }
 0x163   :  { %v292_v5 = vpop.f32.mrf.mxu1 }
 0x164   :  { %v293_v7 = vadd.f32 %v568_v58, %v292_v5 }
 0x166   :  { %v319_v8 = vpack.c.bf16 %v293_v7, %v291_v6 }
 0x168   :  { %390 = vmatmul.bf16.gmra.mxu2 %v319_v8 }
 0x16b   :  { %v295_v9 = vpop.f32.mrf.mxu1 }
 0x16c   :  { %v296_v11 = vadd.f32 %v568_v58, %v295_v9 }
 0x173   :  { %v297_v10 = vpop.f32.mrf.mxu1 }
 0x174   :  { %v298_v12 = vadd.f32 %v568_v58, %v297_v10 }
 0x176   :  { %v320_v13 = vpack.c.bf16 %v298_v12, %v296_v11 }
 0x178   :  { %395 = vmatmul.bf16.gmra.mxu2 %v320_v13 }
 0x1cb   :  { %v381_v15 = vpop.f32.mrf.mxu2 }
 0x1cc   :  { %v382_v16 = vadd.f32 %v569_v14, %v381_v15 }
 0x1ce   :  { %401 = vst [vmem:[#allocation10] sm:$0xff] %v382_v16 }
 0x1d3   :  { %v383_v17 = vpop.f32.mrf.mxu2 }
 0x1d4   :  { %v384_v18 = vadd.f32 %v569_v14, %v383_v17 }
 0x1d6   :  { %402 = vst [vmem:[#allocation10 + $0x8] sm:$0xff] %v384_v18 }
 0x1db   :  { %v386_v19 = vpop.f32.mrf.mxu2 }
 0x1dc   :  { %v387_v20 = vadd.f32 %v569_v14, %v386_v19 }
 0x1de   :  { %403 = vst [vmem:[#allocation10 + $0x10] sm:$0xff] %v387_v20 }
 0x1e3   :  { %v388_v21 = vpop.f32.mrf.mxu2 }
 0x1e4   :  { %v389_v22 = vadd.f32 %v569_v14, %v388_v21 }
 0x1e6   :  { %404 = vst [vmem:[#allocation10 + $0x18] sm:$0xff] %v389_v22 }
 0x1eb   :  { %v391_v23 = vpop.f32.mrf.mxu2 }
 0x1ec   :  { %v392_v24 = vadd.f32 %v569_v14, %v391_v23 }
 0x1ee   :  { %405 = vst [vmem:[#allocation10 + $0x20] sm:$0xff] %v392_v24 }
 0x1f3   :  { %v393_v25 = vpop.f32.mrf.mxu2 }
 0x1f4   :  { %v394_v26 = vadd.f32 %v569_v14, %v393_v25 }
 0x1f6   :  { %406 = vst [vmem:[#allocation10 + $0x28] sm:$0xff] %v394_v26 }
 0x1fb   :  { %v396_v27 = vpop.f32.mrf.mxu2 }
 0x1fc   :  { %v397_v28 = vadd.f32 %v569_v14, %v396_v27 }
 0x1fe   :  { %407 = vst [vmem:[#allocation10 + $0x30] sm:$0xff] %v397_v28 }
 0x203   :  { %v398_v29 = vpop.f32.mrf.mxu2 }
 0x204   :  { %v399_v30 = vadd.f32 %v569_v14, %v398_v29 }
 0x206   :  { %408 = vst [vmem:[#allocation10 + $0x38] sm:$0xff] %v399_v30 }
 0x207   :  { %421 = dma.vmem_to_hbm [thread:$0]  %s414_s25, 1024, %s416_s28, [#allocation4], %s702_s13, %s702_s13, %s703_s14  }
 0x208   :  { %696 = dma.done.wait [#allocation4], 1024  }
 0x209   :  { %697 = vsyncadd [#allocation4], 4294966272 }
 0x20a   :  { %426 = vsyncpa [#allocation3], 1 }
 0x20b   :  { %427 = vsyncpa [#allocation6], 1 }
 0x20c   :  { %428 = vsyncpa [#allocation9], 1 }
 0x20d   :  { %429 = vsyncpa [#allocation4], 1 }

</bundles_post_ra>
